<compile_context>
chip_gen: v7x
topology: tpu7x:2x2x1
jax: 0.10.0
libtpu: 0.0.40
codegen_flags: <defaults>
</compile_context>

<pallas_src>
import functools
import math

import jax
import jax.numpy as jnp
from jax import lax
from jax.experimental import pallas as pl
from jax.experimental.pallas import tpu as pltpu


def _round_up(v, m):
    return (v + m - 1) // m * m


# ---------------------------------------------------------------------------
# Kernel 1: row-wise L2 normalize, matching F.normalize: x / max(||x||, 1e-12)
# ---------------------------------------------------------------------------
def _l2_normalize_kernel(x_ref, o_ref):
    x = x_ref[...].astype(jnp.float32)
    ss = jnp.sum(x * x, axis=-1, keepdims=True)
    inv = lax.rsqrt(jnp.maximum(ss, 1e-24))      # == 1 / max(||x||, 1e-12)
    o_ref[...] = (x * inv).astype(o_ref.dtype)


def _l2_normalize_rows(x, *, block_rows, out_dtype):
    n, d = x.shape
    assert n % block_rows == 0
    return pl.pallas_call(
        _l2_normalize_kernel,
        out_shape=jax.ShapeDtypeStruct((n, d), out_dtype),
        grid=(n // block_rows,),
        in_specs=[pl.BlockSpec((block_rows, d), lambda i: (i, 0))],
        out_specs=pl.BlockSpec((block_rows, d), lambda i: (i, 0)),
        compiler_params=pltpu.CompilerParams(
            dimension_semantics=("parallel",)),
    )(x)


# ---------------------------------------------------------------------------
# Kernel 2: cosine matmul + arc margin + one-hot blend + scale
# ---------------------------------------------------------------------------
def _arc_margin_kernel(label_ref, xn_ref, wn_ref, out_ref, *,
                       s, cos_m, sin_m, th, mm, ls_eps, easy_margin,
                       out_features, block_c):
    # cosine = xn @ wn.T without materializing the transpose: contract dim 1 of
    # both operands (bf16/f32 operands, f32 accumulation on the MXU).
    cosine = lax.dot_general(
        xn_ref[...], wn_ref[...],
        dimension_numbers=(((1,), (1,)), ((), ())),
        preferred_element_type=jnp.float32)                      # (bm, bc)

    sine = jnp.sqrt(jnp.maximum(1.0 - cosine * cosine, 0.0))
    phi = cosine * cos_m - sine * sin_m
    if easy_margin:
        phi = jnp.where(cosine > 0.0, phi, cosine)
    else:
        phi = jnp.where(cosine > th, phi, cosine - mm)

    # one-hot via iota compare against the *global* class index of this C tile.
    labels = label_ref[...]                                      # (bm, 1) int32
    col0 = pl.program_id(1) * block_c
    class_ids = col0 + lax.broadcasted_iota(jnp.int32, cosine.shape, 1)
    one_hot = (class_ids == labels).astype(jnp.float32)
    if ls_eps > 0.0:
        # label smoothing uses the TRUE number of classes, not the padded width
        one_hot = (1.0 - ls_eps) * one_hot + ls_eps / out_features

    # (one_hot*phi + (1-one_hot)*cosine) * s with one fewer (bm,bc) multiply.
    out_ref[...] = ((cosine + one_hot * (phi - cosine)) * s).astype(out_ref.dtype)


def arc_margin_product(x, weight, label, *, s=30.0, m=0.5,
                       easy_margin=False, ls_eps=0.0,
                       compute_dtype=jnp.bfloat16,
                       block_b=128, block_c=512):
    """Pallas equivalent of ArcMarginProduct.forward(input, label)."""
    B, D = x.shape
    C, D2 = weight.shape
    assert D == D2

    # Tile sizes: batch tile multiple of 8, class tile multiple of 128
    # (lane-dense output stores, MXU-aligned N).  Pad B/C up to tile multiples.
    bm = min(block_b, _round_up(B, 8))
    bc = min(block_c, _round_up(C, 128))
    b_pad = _round_up(B, bm)
    c_pad = _round_up(C, bc)

    x_p = x if b_pad == B else jnp.pad(x, ((0, b_pad - B), (0, 0)))
    w_p = weight if c_pad == C else jnp.pad(weight, ((0, c_pad - C), (0, 0)))
    lbl = label.astype(jnp.int32)
    if b_pad != B:
        lbl = jnp.pad(lbl, (0, b_pad - B))
    lbl = lbl.reshape(b_pad, 1)

    # Hoisted normalization: one pass over x and one over W (not per B tile).
    xn = _l2_normalize_rows(x_p, block_rows=bm, out_dtype=compute_dtype)
    wn = _l2_normalize_rows(w_p, block_rows=bc, out_dtype=compute_dtype)

    kernel = functools.partial(
        _arc_margin_kernel,
        s=float(s),
        cos_m=math.cos(m),
        sin_m=math.sin(m),
        th=math.cos(math.pi - m),
        mm=math.sin(math.pi - m) * m,
        ls_eps=float(ls_eps),
        easy_margin=bool(easy_margin),
        out_features=C,
        block_c=bc,
    )

    out = pl.pallas_call(
        kernel,
        out_shape=jax.ShapeDtypeStruct((b_pad, c_pad), jnp.float32),
        grid=(b_pad // bm, c_pad // bc),
        in_specs=[
            pl.BlockSpec((bm, 1), lambda i, j: (i, 0)),    # labels
            pl.BlockSpec((bm, D), lambda i, j: (i, 0)),    # normalized x tile
            pl.BlockSpec((bc, D), lambda i, j: (j, 0)),    # normalized W tile
        ],
        out_specs=pl.BlockSpec((bm, bc), lambda i, j: (i, j)),
        compiler_params=pltpu.CompilerParams(
            dimension_semantics=("parallel", "parallel")),
    )(lbl, xn, wn)

    return out[:B, :C]


# ---------------------------------------------------------------------------
# Pure-JAX reference (mirrors the PyTorch module, fp32 end to end)
# ---------------------------------------------------------------------------
def _reference(x, weight, label, *, s=30.0, m=0.5, easy_margin=False, ls_eps=0.0):
    eps = 1e-12
    xn = x / jnp.maximum(jnp.linalg.norm(x, axis=-1, keepdims=True), eps)
    wn = weight / jnp.maximum(jnp.linalg.norm(weight, axis=-1, keepdims=True), eps)
    cosine = xn @ wn.T
    sine = jnp.sqrt(jnp.maximum(1.0 - cosine ** 2, 0.0))
    phi = cosine * math.cos(m) - sine * math.sin(m)
    if easy_margin:
        phi = jnp.where(cosine > 0, phi, cosine)
    else:
        phi = jnp.where(cosine > math.cos(math.pi - m),
                        phi, cosine - math.sin(math.pi - m) * m)
    one_hot = jax.nn.one_hot(label, weight.shape[0], dtype=jnp.float32)
    if ls_eps > 0:
        one_hot = (1 - ls_eps) * one_hot + ls_eps / weight.shape[0]
    return (one_hot * phi + (1.0 - one_hot) * cosine) * s


if __name__ == "__main__":
    # Small synthetic config: batch=8, in_features=32, out_features=16
    B, in_features, out_features = 8, 32, 16
    key = jax.random.PRNGKey(0)
    kx, kw, kl = jax.random.split(key, 3)

    x = jax.random.normal(kx, (B, in_features), dtype=jnp.float32)

    # xavier_uniform_ on (out_features, in_features): U(-a, a), a = sqrt(6/(fi+fo))
    bound = math.sqrt(6.0 / (in_features + out_features))
    weight = jax.random.uniform(kw, (out_features, in_features),
                                dtype=jnp.float32, minval=-bound, maxval=bound)

    label = jax.random.randint(kl, (B,), 0, out_features, dtype=jnp.int32)

    ref = _reference(x, weight, label, s=30.0, m=0.5, easy_margin=False, ls_eps=0.0)

    # 1) Exact-semantics check: f32 MXU operands.
    out_f32 = arc_margin_product(x, weight, label, s=30.0, m=0.5,
                                 easy_margin=False, ls_eps=0.0,
                                 compute_dtype=jnp.float32)
    out_f32 = jax.block_until_ready(out_f32)
    assert out_f32.shape == (B, out_features)
    assert jnp.allclose(out_f32, ref, atol=5e-4, rtol=5e-4), "f32 path mismatch"

    # 2) Performance configuration: bf16 MXU operands, f32 accumulation.
    #    bf16 quantization of the unit-norm operands bounds |delta cosine| by a
    #    few 1e-3, i.e. a few 1e-2 after scaling by s=30.
    out_bf16 = arc_margin_product(x, weight, label, s=30.0, m=0.5,
                                  easy_margin=False, ls_eps=0.0,
                                  compute_dtype=jnp.bfloat16)
    out_bf16 = jax.block_until_ready(out_bf16)
    assert out_bf16.shape == (B, out_features)
    assert float(jnp.max(jnp.abs(out_bf16 - ref))) < 0.5, "bf16 path mismatch"

    # 3) Exercise easy_margin / label-smoothing branches (f32 path).
    out_ls = arc_margin_product(x, weight, label, s=30.0, m=0.5,
                                easy_margin=True, ls_eps=0.1,
                                compute_dtype=jnp.float32)
    out_ls = jax.block_until_ready(out_ls)
    ref_ls = _reference(x, weight, label, s=30.0, m=0.5,
                        easy_margin=True, ls_eps=0.1)
    assert jnp.allclose(out_ls, ref_ls, atol=5e-4, rtol=5e-4), "ls/easy mismatch"

    print("KERNEL_OK")
</pallas_src>

<mosaic_0001>
module attributes {stable_mosaic.version = 11 : i64} {
  func.func @_l2_normalize_kernel(%arg0: i32, %arg1: memref<8x32xf32, #tpu.memory_space<vmem>>, %arg2: memref<8x32xf32, #tpu.memory_space<vmem>>) attributes {dimension_semantics = [#tpu.dimension_semantics<parallel>], iteration_bounds = array<i64: 1>, scalar_prefetch = 0 : i64, scratch_operands = 0 : i64, tpu.core_type = #tpu.core_type<tc>, window_params = [{transform_indices = @transform_0, window_bounds = array<i64: 8, 32>}, {transform_indices = @transform_1, window_bounds = array<i64: 8, 32>}]} {
    %c0 = arith.constant 0 : index
    %c0_0 = arith.constant 0 : index
    %0 = vector.load %arg1[%c0, %c0_0] : memref<8x32xf32, #tpu.memory_space<vmem>>, vector<8x32xf32>
    %1 = arith.mulf %0, %0 : vector<8x32xf32>
    %cst = arith.constant dense<0.000000e+00> : vector<8xf32>
    %2 = vector.multi_reduction <add>, %1, %cst [1] : vector<8x32xf32> to vector<8xf32>
    %3 = vector.shape_cast %2 : vector<8xf32> to vector<8x1xf32>
    %cst_1 = arith.constant 1.000000e-24 : f32
    %4 = vector.broadcast %cst_1 : f32 to vector<8x1xf32>
    %5 = arith.maximumf %3, %4 : vector<8x1xf32>
    %6 = math.rsqrt %5 : vector<8x1xf32>
    %7 = vector.broadcast %6 : vector<8x1xf32> to vector<8x32xf32>
    %8 = arith.mulf %0, %7 : vector<8x32xf32>
    %c0_2 = arith.constant 0 : index
    %c0_3 = arith.constant 0 : index
    %9 = vector.load %arg2[%c0_2, %c0_3] : memref<8x32xf32, #tpu.memory_space<vmem>>, vector<8x32xf32>
    tpu.vector_store %arg2[%c0_2, %c0_3], %8 {strides = array<i32>} : memref<8x32xf32, #tpu.memory_space<vmem>>, vector<8x32xf32>,
    return
  }
  func.func @transform_0(%arg0: i32) -> (i32, i32) {
    %c0_i32 = arith.constant 0 : i32
    %c0_i32_0 = arith.constant 0 : i32
    return %arg0, %c0_i32 : i32, i32
  }
  func.func @transform_1(%arg0: i32) -> (i32, i32) {
    %c0_i32 = arith.constant 0 : i32
    %c0_i32_0 = arith.constant 0 : i32
    return %arg0, %c0_i32 : i32, i32
  }
}

</mosaic_0001>

<bundles_post_ra>
// kernel: tpu_custom_call.1
= control target key start
LH: loop header
LB: loop body
LE: loop exit
PB: predicated region body
PF: predicated region fallthrough
CT: control target
= control target key end

     0   :  { %6 = vsyncpa [#allocation3], 0  ;;  %s134_s0 = inlined_call_operand.hbm [shape: f32[8,32], index: 0, kind: input, shape index: {}]   ;;  %s135_s1 = inlined_call_operand.hbm [shape: f32[8,32], index: 1, kind: output, shape index: {}]  }
   0x1   :  { %7 = vsyncpa [#allocation4], 0  ;;  %s98_s6 = smov [#allocation2]   ;;  %s50_s10 = scalar_lea.hbm %s134_s0, 128 }
   0x2   :  { %s14_s7 = sshll.u32 %s98_s6, 4  ;;  %p51_p0 = scmp.ne.s32.totalorder %s134_s0, %s50_s10  ;;  %s15_s7 = int_to_ptr.vmem [resolvable:$true] %s14_s7 }
   0x3   :  { %p54_p1 = scmp.lt.u32.totalorder %s50_s10, %s134_s0 }
   0x5   :  { %p56_p2 = pnand %p54_p1, %p51_p0 }
   0x7   :  { %59 = shalt.err (!%p56_p2)
}
   0x8   :  { %s60_s15 = scalar_lea.vmem %s15_s7, 128  ;;  %p65_p4 = scmp.lt.s32.totalorder %s15_s7, %s15_s7 }
   0x9   :  { %p61_p3 = scmp.ne.s32.totalorder %s15_s7, %s60_s15  ;;  %p66_p5 = scmp.lt.s32.totalorder %s60_s15, %s60_s15 }
   0xb   :  { %p67_p6 = por %p66_p5, %p65_p4 }
   0xd   :  { %p68_p7 = pnand %p67_p6, %p61_p3 }
   0xf   :  { %71 = shalt.err (!%p68_p7)
}
  0x10   :  { %17 = dma.hbm_to_vmem [thread:$0]  %s134_s0, 128, %s15_s7, [#allocation3]  }
  0x11   :  { %94 = dma.done.wait [#allocation3], 128  }
  0x12   :  { %95 = vsyncadd [#allocation3], 4294967168  ;;  %v21_v0 = vld [vmem:[#allocation2] sm:$0xff]  ;;  %vm23_vm0 = vcmask 261120   ;;  %s99_s18 = smov [#allocation5]  }
  0x13   :  { %v22_v1 = vmul.f32 %v21_v0, %v21_v0  ;;  %s37_s19 = sshll.u32 %s99_s18, 4  ;;  %s38_s19 = int_to_ptr.vmem [resolvable:$true] %s37_s19 }
  0x14   :  { %s72_s20 = scalar_lea.vmem %s38_s19, 128  ;;  %p77_p9 = scmp.lt.s32.totalorder %s38_s19, %s38_s19 }
  0x15   :  { %v24_v2 = vsel %vm23_vm0, %v22_v1, 0.0  ;;  %p73_p8 = scmp.ne.s32.totalorder %s38_s19, %s72_s20  ;;  %p78_p10 = scmp.lt.s32.totalorder %s72_s20, %s72_s20 }
  0x16   :  { %25 = vadd.xlane.f32.xlu0 %v24_v2 }
  0x17   :  { %p79_p11 = por %p78_p10, %p77_p9 }
  0x19   :  { %p80_p12 = pnand %p79_p11, %p73_p8 }
  0xa3   :  { %v26_v3 = vpop.xlane.xlu0 %25 }
  0xa4   :  { %v27_v4 = vmax.f32 %v26_v3, 1e-24 }
  0xa6   :  { %48 = vrsqrt.f32 %v27_v4 }
  0xb0   :  { %v49_v5 = vpop.eup %48 }
  0xb1   :  { %v29_v6 = vmul.f32 %v49_v5, %v21_v0 }
  0xb3   :  { %30 = vst.msk [vmem:[#allocation5] sm:$0xff] %vm23_vm0, %v29_v6 }
  0xb4   :  { %83 = shalt.err (!%p80_p12)
}
  0xb5   :  { %s84_s22 = scalar_lea.hbm %s135_s1, 128 }
  0xb6   :  { %p85_p13 = scmp.ne.s32.totalorder %s135_s1, %s84_s22  ;;  %p88_p0 = scmp.lt.u32.totalorder %s84_s22, %s135_s1 }
  0xb8   :  { %p90_p1 = pnand %p88_p0, %p85_p13 }
  0xba   :  { %93 = shalt.err (!%p90_p1)
}
  0xbb   :  { %40 = dma.vmem_to_hbm [thread:$0]  %s38_s19, 128, %s135_s1, [#allocation4]  }
  0xbc   :  { %96 = dma.done.wait [#allocation4], 128  }
  0xbd   :  { %97 = vsyncadd [#allocation4], 4294967168 }
  0xbe   :  { %44 = vsyncpa [#allocation3], 1 }
  0xbf   :  { %45 = vsyncpa [#allocation4], 1 }

</bundles_post_ra>
